<compile_context>
chip_gen: v7x
topology: tpu7x:2x2x1
jax: 0.10.0
libtpu: 0.0.40
codegen_flags: <defaults>
</compile_context>

<pallas_src>
import math

import jax
import jax.numpy as jnp
from jax import lax
from jax.experimental import pallas as pl
from jax.experimental.pallas import tpu as pltpu


def _gcn_kernel(adj_ref, feats_ref, wt_ref, b_ref, o_ref, acc_ref):
    """Grid = (node-batch tiles [parallel], N-reduction tiles [arbitrary])."""
    k = pl.program_id(1)

    @pl.when(k == 0)
    def _init():
        acc_ref[...] = jnp.zeros_like(acc_ref)

    # Neighbor aggregation on the MXU: (TB, TN) @ (TN, Ep) -> (TB, Ep).
    # Rows of adj already carry the 1/sqrt(i) normalization (true degree).
    # Inputs may be bf16; accumulation is f32.
    acc_ref[...] += jnp.dot(adj_ref[...], feats_ref[...],
                            preferred_element_type=jnp.float32)

    @pl.when(k == pl.num_programs(1) - 1)
    def _finalize():
        # Linear: W was pre-transposed in the wrapper -> plain matmul on the
        # f32 accumulator against the f32 resident weight (no re-rounding).
        y = jnp.dot(acc_ref[...], wt_ref[...],
                    preferred_element_type=jnp.float32) + b_ref[...]
        # leaky_relu, negative_slope = 0.2
        o_ref[...] = jnp.where(y > 0, y, 0.2 * y).astype(o_ref.dtype)


def _round_up(x, m):
    return ((x + m - 1) // m) * m


def _pad2(x, rows, cols):
    r, c = x.shape
    if r == rows and c == cols:
        return x
    return jnp.pad(x, ((0, rows - r), (0, cols - c)))


def gcn_forward(adj, feats, w, b, *, block_b=256, block_n=512,
                compute_dtype=jnp.bfloat16, out_dtype=jnp.float32):
    """adj:   (B, N) normalized adjacency, rows scaled by 1/sqrt(i_b)
       feats: (N, E) node features f
       w:     (E, E) PyTorch Linear weight (out, in) -- NOT pre-transposed
       b:     (E,)   PyTorch Linear bias
       Returns (B, E) = leaky_relu((adj @ feats) @ w.T + b, 0.2).

       compute_dtype applies to the streamed operands (adj, feats); the
       aggregation and the Linear both accumulate / run in f32."""
    bsz, n = adj.shape
    n2, e = feats.shape
    assert n2 == n and w.shape == (e, e) and b.shape == (e,)

    # ---- lane-dense padding: E -> multiple of 128 (full vst, full MXU cols).
    ep = _round_up(max(e, 128), 128)

    # ---- node-batch tile: multiple of the sublane packing; keep >= 2 grid
    #      steps along the parallel axis when the batch allows it (v7x has
    #      2 TensorCores; harmless on single-TC v5e/v6e). B is padded to a
    #      multiple of the tile, so no partially-garbage last block.
    sub = 16 if jnp.dtype(compute_dtype) == jnp.dtype(jnp.bfloat16) else 8
    bp = _round_up(bsz, sub)
    bb = min(_round_up(min(block_b, bp), sub), bp)
    if bb == bp and bp >= 2 * sub:
        bb = _round_up((bp + 1) // 2, sub)
    bp = _round_up(bsz, bb)

    # ---- N (reduction) tiling: keep feats fully resident only if it fits in
    #      one tile, otherwise stream 128-multiple tiles along an "arbitrary"
    #      grid axis and accumulate in VMEM scratch.
    if n <= block_n:
        tn, np_ = n, n
    else:
        tn = _round_up(block_n, 128)
        np_ = _round_up(n, tn)

    adj_c = _pad2(adj, bp, np_).astype(compute_dtype)
    feats_c = _pad2(feats, np_, ep).astype(compute_dtype)
    # Pre-transpose the PyTorch (out, in) weight once in the wrapper (tiny
    # XLA transpose) so the kernel does a plain matmul; keep it f32 so the
    # second matmul never re-rounds the f32 aggregation to bf16.
    wt = _pad2(w.T.astype(jnp.float32), ep, ep)
    b2 = _pad2(b.reshape(1, e).astype(jnp.float32), 1, ep)

    grid = (bp // bb, np_ // tn)

    # ---- VMEM budget: each pipelined operand is double-buffered.
    itm = jnp.dtype(compute_dtype).itemsize
    need = (2 * (bb * tn * itm            # adj tile
                 + tn * ep * itm          # feats tile
                 + ep * ep * 4            # W^T (resident)
                 + ep * 4                 # bias (resident)
                 + bb * ep * jnp.dtype(out_dtype).itemsize)  # out tile
            + bb * ep * 4)                # f32 accumulator scratch
    cp = dict(dimension_semantics=("parallel", "arbitrary"))
    if need > (16 << 20):
        # Raise scoped VMEM above the conservative default, with headroom,
        # but stay under v7x's 64 MiB physical VMEM.
        cp["vmem_limit_bytes"] = min(int(need * 1.5), 60 << 20)

    out = pl.pallas_call(
        _gcn_kernel,
        out_shape=jax.ShapeDtypeStruct((bp, ep), out_dtype),
        grid_spec=pltpu.PrefetchScalarGridSpec(
            num_scalar_prefetch=0,
            grid=grid,
            in_specs=[
                pl.BlockSpec((bb, tn), lambda i, k: (i, k)),   # adj tile
                pl.BlockSpec((tn, ep), lambda i, k: (k, 0)),   # feats tile
                pl.BlockSpec((ep, ep), lambda i, k: (0, 0)),   # W^T (resident)
                pl.BlockSpec((1, ep), lambda i, k: (0, 0)),    # bias (resident)
            ],
            out_specs=pl.BlockSpec((bb, ep), lambda i, k: (i, 0)),
            scratch_shapes=[pltpu.VMEM((bb, ep), jnp.float32)],
        ),
        compiler_params=pltpu.CompilerParams(**cp),
    )(adj_c, feats_c, wt, b2)

    return out[:bsz, :e]


def _reference(adj, feats, w, b):
    nb = jnp.dot(adj, feats, precision=lax.Precision.HIGHEST)
    y = jnp.dot(nb, w.T, precision=lax.Precision.HIGHEST) + b
    return jnp.where(y > 0, y, 0.2 * y)


if __name__ == "__main__":
    emb_size = 32      # E (module's emb_size)
    num_nodes = 256    # N: graph nodes that have features in f
    num_targets = 16   # B: target nodes x processed in one batched call

    key = jax.random.PRNGKey(0)
    k_f, k_w, k_b = jax.random.split(key, 3)

    feats = jax.random.normal(k_f, (num_nodes, emb_size), dtype=jnp.float32)
    # PyTorch Linear init ranges: weight (out, in), bias (out,).
    bound = 1.0 / math.sqrt(emb_size)
    w = jax.random.uniform(k_w, (emb_size, emb_size), jnp.float32, -bound, bound)
    b = jax.random.uniform(k_b, (emb_size,), jnp.float32, -bound, bound)

    # Host-side stand-in for the rdflib traversal: deterministic edge list
    # x -> {(x+1+j) % N : j < deg_x}, folded into a normalized adjacency.
    rows = []
    for x in range(num_targets):
        deg = 1 + (x % 5)                      # number of (x, p, o) triples
        i = 1 + deg                            # self + neighbors (torch `i`)
        scale = 1.0 / math.sqrt(float(i))      # uses true count, not padded N
        row = [0.0] * num_nodes
        row[x] += scale                        # f[x]
        for j in range(deg):
            row[(x + 1 + j) % num_nodes] += scale   # f[o]
        rows.append(row)
    adj = jnp.asarray(rows, dtype=jnp.float32)  # (B, N)

    ref = _reference(adj, feats, w, b)

    # Default path: bf16 streamed inputs (v6e/v7x MXU), f32 accumulation.
    out_bf16 = jax.block_until_ready(gcn_forward(adj, feats, w, b))
    assert out_bf16.shape == (num_targets, emb_size)
    err_bf16 = float(jnp.max(jnp.abs(out_bf16 - ref)))
    assert jnp.allclose(out_bf16, ref, atol=1e-1, rtol=5e-2), err_bf16

    # f32 path with a tiled N-reduction axis (exercises the accumulator
    # init/finalize logic): tight tolerance against the f32 reference.
    out_f32 = jax.block_until_ready(
        gcn_forward(adj, feats, w, b, compute_dtype=jnp.float32, block_n=128))
    err_f32 = float(jnp.max(jnp.abs(out_f32 - ref)))
    assert jnp.allclose(out_f32, ref, atol=1e-4, rtol=1e-4), err_f32

    print("KERNEL_OK")
</pallas_src>

<mosaic_0001>
module attributes {stable_mosaic.version = 11 : i64} {
  func.func @_gcn_kernel(%arg0: i32, %arg1: i32, %arg2: memref<16x256xbf16, #tpu.memory_space<vmem>>, %arg3: memref<256x128xbf16, #tpu.memory_space<vmem>>, %arg4: memref<128x128xf32, #tpu.memory_space<vmem>>, %arg5: memref<1x128xf32, #tpu.memory_space<vmem>>, %arg6: memref<16x128xf32, #tpu.memory_space<vmem>>, %arg7: memref<16x128xf32, #tpu.memory_space<vmem>>) attributes {dimension_semantics = [#tpu.dimension_semantics<parallel>, #tpu.dimension_semantics<arbitrary>], iteration_bounds = array<i64: 1, 1>, scalar_prefetch = 0 : i64, scratch_operands = 1 : i64, tpu.core_type = #tpu.core_type<tc>, window_params = [{transform_indices = @transform_0, window_bounds = array<i64: 16, 256>}, {transform_indices = @transform_1, window_bounds = array<i64: 256, 128>}, {pipeline_mode = #tpu.pipeline_mode<synchronous>, transform_indices = @transform_2, window_bounds = array<i64: 128, 128>}, {pipeline_mode = #tpu.pipeline_mode<synchronous>, transform_indices = @transform_3, window_bounds = array<i64: 1, 128>}, {transform_indices = @transform_4, window_bounds = array<i64: 16, 128>}]} {
    %c0_i32 = arith.constant 0 : i32
    %0 = arith.cmpi eq, %arg1, %c0_i32 : i32
    %1 = arith.extui %0 : i1 to i32
    %c0_i32_0 = arith.constant 0 : i32
    %2 = arith.cmpi ne, %1, %c0_i32_0 : i32
    scf.if %2 {
      %cst_10 = arith.constant 0.000000e+00 : f32
      %12 = vector.broadcast %cst_10 : f32 to vector<16x128xf32>
      %c0_11 = arith.constant 0 : index
      %c0_12 = arith.constant 0 : index
      %13 = vector.load %arg7[%c0_11, %c0_12] : memref<16x128xf32, #tpu.memory_space<vmem>>, vector<16x128xf32>
      tpu.vector_store %arg7[%c0_11, %c0_12], %12 {strides = array<i32>} : memref<16x128xf32, #tpu.memory_space<vmem>>, vector<16x128xf32>,
    } else {
    }
    %c0 = arith.constant 0 : index
    %c0_1 = arith.constant 0 : index
    %3 = vector.load %arg7[%c0, %c0_1] : memref<16x128xf32, #tpu.memory_space<vmem>>, vector<16x128xf32>
    %c0_2 = arith.constant 0 : index
    %c0_3 = arith.constant 0 : index
    %4 = vector.load %arg2[%c0_2, %c0_3] : memref<16x256xbf16, #tpu.memory_space<vmem>>, vector<16x256xbf16>
    %c0_4 = arith.constant 0 : index
    %c0_5 = arith.constant 0 : index
    %5 = vector.load %arg3[%c0_4, %c0_5] : memref<256x128xbf16, #tpu.memory_space<vmem>>, vector<256x128xbf16>
    %cst = arith.constant dense<0.000000e+00> : vector<16x128xf32>
    %6 = tpu.matmul %4, %5, %cst {dimension_numbers = #tpu.dot_dimension_numbers<[1], [0], [0], [1], [0, 0, 1, 1], [], []>} : vector<16x256xbf16>, vector<256x128xbf16>, vector<16x128xf32> -> vector<16x128xf32>
    %7 = arith.addf %3, %6 : vector<16x128xf32>
    %c0_6 = arith.constant 0 : index
    %c0_7 = arith.constant 0 : index
    %8 = vector.load %arg7[%c0_6, %c0_7] : memref<16x128xf32, #tpu.memory_space<vmem>>, vector<16x128xf32>
    tpu.vector_store %arg7[%c0_6, %c0_7], %7 {strides = array<i32>} : memref<16x128xf32, #tpu.memory_space<vmem>>, vector<16x128xf32>,
    %c0_i32_8 = arith.constant 0 : i32
    %9 = arith.cmpi eq, %arg1, %c0_i32_8 : i32
    %10 = arith.extui %9 : i1 to i32
    %c0_i32_9 = arith.constant 0 : i32
    %11 = arith.cmpi ne, %10, %c0_i32_9 : i32
    scf.if %11 {
      %c0_10 = arith.constant 0 : index
      %c0_11 = arith.constant 0 : index
      %12 = vector.load %arg7[%c0_10, %c0_11] : memref<16x128xf32, #tpu.memory_space<vmem>>, vector<16x128xf32>
      %c0_12 = arith.constant 0 : index
      %c0_13 = arith.constant 0 : index
      %13 = vector.load %arg4[%c0_12, %c0_13] : memref<128x128xf32, #tpu.memory_space<vmem>>, vector<128x128xf32>
      %cst_14 = arith.constant dense<0.000000e+00> : vector<16x128xf32>
      %14 = tpu.matmul %12, %13, %cst_14 {dimension_numbers = #tpu.dot_dimension_numbers<[1], [0], [0], [1], [0, 0, 1, 1], [], []>} : vector<16x128xf32>, vector<128x128xf32>, vector<16x128xf32> -> vector<16x128xf32>
      %c0_15 = arith.constant 0 : index
      %c0_16 = arith.constant 0 : index
      %15 = vector.load %arg5[%c0_15, %c0_16] : memref<1x128xf32, #tpu.memory_space<vmem>>, vector<1x128xf32>
      %16 = vector.broadcast %15 : vector<1x128xf32> to vector<16x128xf32>
      %17 = arith.addf %14, %16 : vector<16x128xf32>
      %cst_17 = arith.constant 0.000000e+00 : f32
      %18 = vector.broadcast %cst_17 : f32 to vector<16x128xf32>
      %19 = arith.cmpf ogt, %17, %18 : vector<16x128xf32>
      %cst_18 = arith.constant 2.000000e-01 : f32
      %20 = vector.broadcast %cst_18 : f32 to vector<16x128xf32>
      %21 = arith.mulf %20, %17 : vector<16x128xf32>
      %22 = arith.select %19, %17, %21 : vector<16x128xi1>, vector<16x128xf32>
      %c0_19 = arith.constant 0 : index
      %c0_20 = arith.constant 0 : index
      %23 = vector.load %arg6[%c0_19, %c0_20] : memref<16x128xf32, #tpu.memory_space<vmem>>, vector<16x128xf32>
      tpu.vector_store %arg6[%c0_19, %c0_20], %22 {strides = array<i32>} : memref<16x128xf32, #tpu.memory_space<vmem>>, vector<16x128xf32>,
    } else {
    }
    return
  }
  func.func @transform_0(%arg0: i32, %arg1: i32) -> (i32, i32) {
    %c0_i32 = arith.constant 0 : i32
    return %arg0, %arg1 : i32, i32
  }
  func.func @transform_1(%arg0: i32, %arg1: i32) -> (i32, i32) {
    %c0_i32 = arith.constant 0 : i32
    %c0_i32_0 = arith.constant 0 : i32
    return %arg1, %c0_i32 : i32, i32
  }
  func.func @transform_2(%arg0: i32, %arg1: i32) -> (i32, i32) {
    %c0_i32 = arith.constant 0 : i32
    %c0_i32_0 = arith.constant 0 : i32
    %c0_i32_1 = arith.constant 0 : i32
    return %c0_i32, %c0_i32_0 : i32, i32
  }
  func.func @transform_3(%arg0: i32, %arg1: i32) -> (i32, i32) {
    %c0_i32 = arith.constant 0 : i32
    %c0_i32_0 = arith.constant 0 : i32
    %c0_i32_1 = arith.constant 0 : i32
    return %c0_i32, %c0_i32_0 : i32, i32
  }
  func.func @transform_4(%arg0: i32, %arg1: i32) -> (i32, i32) {
    %c0_i32 = arith.constant 0 : i32
    %c0_i32_0 = arith.constant 0 : i32
    return %arg0, %c0_i32 : i32, i32
  }
}

</mosaic_0001>

<bundles_post_ra>
// kernel: tpu_custom_call.1
= control target key start
LH: loop header
LB: loop body
LE: loop exit
PB: predicated region body
PF: predicated region fallthrough
CT: control target
= control target key end

     0   :  { %9 = vsyncpa [#allocation4], 0  ;;  %s722_s0 = inlined_call_operand.hbm [shape: bf16[16,256], index: 0, kind: input, shape index: {}]   ;;  %s723_s1 = inlined_call_operand.hbm [shape: bf16[256,128], index: 1, kind: input, shape index: {}]   ;;  %s724_s2 = inlined_call_operand.hbm [shape: f32[128,128], index: 2, kind: input, shape index: {}]   ;;  %s725_s3 = inlined_call_operand.vmem [shape: f32[1,128], index: 3, kind: input, shape index: {}]   ;;  %s726_s4 = inlined_call_operand.hbm [shape: f32[16,128], index: 4, kind: output, shape index: {}]  }
   0x1   :  { %10 = vsyncpa [#allocation7], 0 }
   0x2   :  { %11 = vsyncpa [#allocation5], 0  ;;  %s629_s15 = smov [#allocation6]   ;;  %s535_s19 = scalar_lea.hbm %s723_s1, 2048 }
   0x3   :  { %s29_s16 = sshll.u32 %s629_s15, 4  ;;  %p536_p0 = scmp.ne.s32.totalorder %s723_s1, %s535_s19  ;;  %s30_s16 = int_to_ptr.vmem [resolvable:$true] %s29_s16 }
   0x4   :  { %p539_p1 = scmp.lt.u32.totalorder %s535_s19, %s723_s1 }
   0x6   :  { %p541_p2 = pnand %p539_p1, %p536_p0 }
   0x8   :  { %544 = shalt.err (!%p541_p2)
}
   0x9   :  { %s545_s24 = scalar_lea.vmem %s30_s16, 2048  ;;  %p550_p4 = scmp.lt.s32.totalorder %s30_s16, %s30_s16 }
   0xa   :  { %p546_p3 = scmp.ne.s32.totalorder %s30_s16, %s545_s24  ;;  %p551_p5 = scmp.lt.s32.totalorder %s545_s24, %s545_s24 }
   0xc   :  { %p552_p6 = por %p551_p5, %p550_p4 }
   0xe   :  { %p553_p7 = pnand %p552_p6, %p546_p3 }
  0x10   :  { %556 = shalt.err (!%p553_p7)
}
  0x11   :  { %s630_s25 = smov 64   ;;  %s631_s26 = smov 4  }
  0x12   :  { %35 = dma.hbm_to_vmem [thread:$0]  %s723_s1, 2048, %s30_s16, [#allocation7], %s630_s25, %s630_s25, %s631_s26  }
  0x13   :  { %s632_s29 = smov [#allocation3]   ;;  %s557_s7 = scalar_lea.hbm %s722_s0, 256 }
  0x14   :  { %s17_s30 = sshll.u32 %s632_s29, 4  ;;  %p558_p8 = scmp.ne.s32.totalorder %s722_s0, %s557_s7  ;;  %s18_s30 = int_to_ptr.vmem [resolvable:$true] %s17_s30 }
  0x15   :  { %p561_p9 = scmp.lt.u32.totalorder %s557_s7, %s722_s0 }
  0x17   :  { %p563_p10 = pnand %p561_p9, %p558_p8 }
  0x19   :  { %566 = shalt.err (!%p563_p10)
}
  0x1a   :  { %s567_s12 = scalar_lea.vmem %s18_s30, 256  ;;  %p572_p12 = scmp.lt.s32.totalorder %s18_s30, %s18_s30 }
  0x1b   :  { %p568_p11 = scmp.ne.s32.totalorder %s18_s30, %s567_s12  ;;  %p573_p13 = scmp.lt.s32.totalorder %s567_s12, %s567_s12 }
  0x1d   :  { %p574_p0 = por %p573_p13, %p572_p12 }
  0x1f   :  { %p575_p1 = pnand %p574_p0, %p568_p11 }
  0x21   :  { %578 = shalt.err (!%p575_p1)
}
  0x22   :  { %s633_s1 = smov 128   ;;  %s634_s13 = smov 8  }
  0x23   :  { %23 = dma.hbm_to_vmem [thread:$0]  %s722_s0, 256, %s18_s30, [#allocation4], %s633_s1, %s633_s1, %s634_s13  }
  0x24   :  { %s635_s16 = smov [#allocation8]   ;;  %s579_s20 = scalar_lea.hbm %s724_s2, 2048 }
  0x25   :  { %s41_s17 = sshll.u32 %s635_s16, 4  ;;  %p580_p2 = scmp.ne.s32.totalorder %s724_s2, %s579_s20  ;;  %s42_s17 = int_to_ptr.vmem [resolvable:$true] %s41_s17 }
  0x26   :  { %p583_p3 = scmp.lt.u32.totalorder %s579_s20, %s724_s2 }
  0x28   :  { %p585_p4 = pnand %p583_p3, %p580_p2 }
  0x2a   :  { %588 = shalt.err (!%p585_p4)
}
  0x2b   :  { %s589_s25 = scalar_lea.vmem %s42_s17, 2048  ;;  %p594_p6 = scmp.lt.s32.totalorder %s42_s17, %s42_s17 }
  0x2c   :  { %p590_p5 = scmp.ne.s32.totalorder %s42_s17, %s589_s25  ;;  %p595_p7 = scmp.lt.s32.totalorder %s589_s25, %s589_s25 }
  0x2e   :  { %p596_p8 = por %p595_p7, %p594_p6 }
  0x30   :  { %p597_p9 = pnand %p596_p8, %p590_p5 }
  0x32   :  { %600 = shalt.err (!%p597_p9)
}
  0x33   :  { %47 = dma.hbm_to_vmem [thread:$0]  %s724_s2, 2048, %s42_s17, [#allocation7], %s633_s1, %s633_s1, %s634_s13  }
  0x34   :  { %623 = dma.done.wait [#allocation4], 256  }
  0x35   :  { %624 = vsyncadd [#allocation4], 4294967040 }
  0x36   :  { %625 = dma.done.wait [#allocation7], 4096  }
  0x37   :  { %626 = vsyncadd [#allocation7], 4294963200  ;;  %v516_v0 = vld [vmem:[#allocation6 + $0x40] sm:$0xff]   ;;  %v518_v2 = vld [vmem:[#allocation6 + $0x48] sm:$0xff]   ;;  %s636_s28 = smov [#allocation9]  }
  0x38   :  { %v517_v1 = vld [vmem:[#allocation6] sm:$0xff]   ;;  %401 = vmatprep.subr.bf16.mxu0 %v516_v0  ;;  %v519_v3 = vld [vmem:[#allocation6 + $0x8] sm:$0xff]   ;;  %v520_v4 = vld [vmem:[#allocation6 + $0x50] sm:$0xff]   ;;  %s369_s29 = sshll.u32 %s636_s28, 4  ;;  %s370_s29 = int_to_ptr.vmem [resolvable:$true] %s369_s29 }
  0x39   :  { %402 = vmatpush3.bf16.msra.mxu0 %v517_v1  ;;  %v521_v5 = vld [vmem:[#allocation6 + $0x10] sm:$0xff]   ;;  %v522_v6 = vld [vmem:[#allocation6 + $0x58] sm:$0xff]   ;;  %v524_v8 = vld [vmem:[#allocation6 + $0x60] sm:$0xff]   ;;  %s601_s30 = scalar_lea.vmem %s370_s29, 256  ;;  %p606_p11 = scmp.lt.s32.totalorder %s370_s29, %s370_s29 }
  0x3a   :  { %403 = vmatprep.subr.bf16.mxu0 %v518_v2  ;;  %v523_v7 = vld [vmem:[#allocation6 + $0x18] sm:$0xff]   ;;  %v525_v9 = vld [vmem:[#allocation6 + $0x20] sm:$0xff]   ;;  %v526_v10 = vld [vmem:[#allocation6 + $0x68] sm:$0xff]   ;;  %p602_p10 = scmp.ne.s32.totalorder %s370_s29, %s601_s30  ;;  %p607_p12 = scmp.lt.s32.totalorder %s601_s30, %s601_s30 }
  0x3b   :  { %v534_v11 = vld [vmem:[#allocation3 + $0x4] ss:$8 sps:$4 sm:$0xff]   ;;  %v258_v12 = vld [vmem:[#allocation8] sm:$0xff]  ;;  %v259_v13 = vld [vmem:[#allocation8 + $0x8] sm:$0xff] }
  0x3c   :  { %v476_v14 = vpack.c.bf16 %v259_v13, %v258_v12  ;;  %v260_v15 = vld [vmem:[#allocation8 + $0x10] sm:$0xff]  ;;  %v261_v16 = vld [vmem:[#allocation8 + $0x18] sm:$0xff]  ;;  %v527_v17 = vld [vmem:[#allocation6 + $0x28] sm:$0xff]   ;;  %240 = vmatprep.mubr.bf16.mxu0 %v534_v11  ;;  %p608_p13 = por %p607_p12, %p606_p11 }
  0x3d   :  { %404 = vmatpush3.bf16.msra.mxu0 %v519_v3  ;;  %v480_v18 = vpack.c.bf16 %v261_v16, %v260_v15  ;;  %v262_v19 = vld [vmem:[#allocation8 + $0x20] sm:$0xff]  ;;  %v263_v20 = vld [vmem:[#allocation8 + $0x28] sm:$0xff]  ;;  %v528_v21 = vld [vmem:[#allocation6 + $0x70] sm:$0xff]  }
  0x3e   :  { %405 = vmatprep.subr.bf16.mxu0 %v520_v4  ;;  %477 = vmatprep.subr.bf16.mxu1 %v476_v14  ;;  %v484_v22 = vpack.c.bf16 %v263_v20, %v262_v19  ;;  %v529_v23 = vld [vmem:[#allocation6 + $0x30] sm:$0xff]   ;;  %v265_v25 = vld [vmem:[#allocation8 + $0x38] sm:$0xff]  ;;  %v266_v29 = vld [vmem:[#allocation8 + $0x40] sm:$0xff]  ;;  %p609_p0 = pnand %p608_p13, %p602_p10 }
  0x3f   :  { %479 = vmatpush3.bf16.msra.mxu1 %v476_v14  ;;  %v264_v24 = vld [vmem:[#allocation8 + $0x30] sm:$0xff]  ;;  %v530_v26 = vld [vmem:[#allocation6 + $0x78] sm:$0xff]   ;;  %v267_v30 = vld [vmem:[#allocation8 + $0x48] sm:$0xff] }
  0x40   :  { %481 = vmatprep.subr.bf16.mxu1 %v480_v18  ;;  %v488_v27 = vpack.c.bf16 %v265_v25, %v264_v24  ;;  %v531_v28 = vld [vmem:[#allocation6 + $0x38] sm:$0xff]   ;;  %v492_v32 = vpack.c.bf16 %v267_v30, %v266_v29  ;;  %v268_v33 = vld [vmem:[#allocation8 + $0x50] sm:$0xff]  ;;  %v270_v36 = vld [vmem:[#allocation8 + $0x60] sm:$0xff] }
  0x41   :  { %406 = vmatpush3.bf16.msra.mxu0 %v521_v5  ;;  %v532_v31 = vld [vmem:[#allocation3] ss:$8 sps:$4 sm:$0xff]   ;;  %v271_v37 = vld [vmem:[#allocation8 + $0x68] sm:$0xff] }
  0x42   :  { %407 = vmatprep.subr.bf16.mxu0 %v522_v6  ;;  %v269_v34 = vld [vmem:[#allocation8 + $0x58] sm:$0xff]  ;;  %v500_v38 = vpack.c.bf16 %v271_v37, %v270_v36  ;;  %v272_v39 = vld [vmem:[#allocation8 + $0x70] sm:$0xff] }
  0x43   :  { %483 = vmatpush3.bf16.msra.mxu1 %v480_v18  ;;  %v496_v35 = vpack.c.bf16 %v269_v34, %v268_v33  ;;  %v273_v40 = vld [vmem:[#allocation8 + $0x78] sm:$0xff]  ;;  %v400_v48 = vld [vmem:[%s725_s3] ss:$0 sm:$0xff] }
  0x44   :  { %485 = vmatprep.subr.bf16.mxu1 %v484_v22  ;;  %v504_v41 = vpack.c.bf16 %v273_v40, %v272_v39 }
  0x45   :  { %408 = vmatpush3.bf16.msra.mxu0 %v523_v7 }
  0x46   :  { %409 = vmatprep.subr.bf16.mxu0 %v524_v8 }
  0x47   :  { %487 = vmatpush3.bf16.msra.mxu1 %v484_v22 }
  0x48   :  { %489 = vmatprep.subr.bf16.mxu1 %v488_v27 }
  0x49   :  { %410 = vmatpush3.bf16.msra.mxu0 %v525_v9 }
  0x4a   :  { %411 = vmatprep.subr.bf16.mxu0 %v526_v10 }
  0x4b   :  { %491 = vmatpush3.bf16.msra.mxu1 %v488_v27 }
  0x4c   :  { %493 = vmatprep.subr.bf16.mxu1 %v492_v32 }
  0x4d   :  { %412 = vmatpush3.bf16.msra.mxu0 %v527_v17 }
  0x4e   :  { %413 = vmatprep.subr.bf16.mxu0 %v528_v21 }
  0x4f   :  { %495 = vmatpush3.bf16.msra.mxu1 %v492_v32 }
  0x50   :  { %497 = vmatprep.subr.bf16.mxu1 %v496_v35 }
  0x51   :  { %414 = vmatpush3.bf16.msra.mxu0 %v529_v23 }
  0x52   :  { %415 = vmatprep.subr.bf16.mxu0 %v530_v26 }
  0x53   :  { %499 = vmatpush3.bf16.msra.mxu1 %v496_v35 }
  0x54   :  { %501 = vmatprep.subr.bf16.mxu1 %v500_v38 }
  0x55   :  { %416 = vmatpush3.bf16.msra.mxu0 %v531_v28 }
  0x57   :  { %503 = vmatpush3.bf16.msra.mxu1 %v500_v38 }
  0x58   :  { %241 = vmatmul.mubr.bf16.vlgmr.msra.gmra.mrb[0].mxu0 %v532_v31  ;;  %505 = vmatprep.subr.bf16.mxu1 %v504_v41 }
  0x5b   :  { %507 = vmatpush3.bf16.msra.mxu1 %v504_v41 }
 0x12b   :  { %v417_v42 = vpop.f32.mrb[0].mxu0 }
 0x12c   :  { %v418_v43 = vpop.f32.mrb[1].mxu0 }
 0x12d   :  { %v420_v44 = vpop.f32.mrb[2].mxu0  ;;  %v419_v45 = vadd.f32 %v418_v43, %v417_v42 }
 0x12e   :  { %v421_v46 = vpop.f32.mrb[3].mxu0 }
 0x12f   :  { %v422_v47 = vadd.f32 %v421_v46, %v420_v44  ;;  %473 = vmatprep.mubr.f32.mxu1 %v419_v45 }
 0x131   :  { %474 = vmatmul.mubr.f32.vlgmr.msra.gmra.mrb[0].mxu1 %v422_v47 }
 0x204   :  { %v475_v49 = vpop.f32.mrb[0].mxu1 }
 0x205   :  { %v353_v50 = vadd.f32 %v475_v49, %v400_v48  ;;  %v347_v51 = vpop.f32.mrb[1].mxu1 }
 0x206   :  { %v348_v52 = vadd.f32 %v400_v48, %v347_v51 }
 0x207   :  { %vm357_vm0 = vcmp.gt.f32.partialorder %v353_v50, 0.0  ;;  %v359_v53 = vmul.f32 0.2, %v353_v50 }
 0x208   :  { %vm356_vm1 = vcmp.gt.f32.partialorder %v348_v52, 0.0  ;;  %v358_v54 = vmul.f32 0.2, %v348_v52 }
 0x209   :  { %v361_v55 = vsel %vm357_vm0, %v353_v50, %v359_v53 }
 0x20a   :  { %v360_v56 = vsel %vm356_vm1, %v348_v52, %v358_v54  ;;  %363 = vst [vmem:[#allocation9 + $0x8] sm:$0xff] %v361_v55 }
 0x20b   :  { %362 = vst [vmem:[#allocation9] sm:$0xff] %v360_v56 }
 0x20c   :  { %612 = shalt.err (!%p609_p0)
}
 0x20d   :  { %s613_s6 = scalar_lea.hbm %s726_s4, 256 }
 0x20e   :  { %p614_p1 = scmp.ne.s32.totalorder %s726_s4, %s613_s6  ;;  %p617_p2 = scmp.lt.u32.totalorder %s613_s6, %s726_s4 }
 0x210   :  { %p619_p3 = pnand %p617_p2, %p614_p1 }
 0x212   :  { %622 = shalt.err (!%p619_p3)
}
 0x213   :  { %375 = dma.vmem_to_hbm [thread:$0]  %s370_s29, 256, %s726_s4, [#allocation5], %s633_s1, %s633_s1, %s634_s13  }
 0x214   :  { %627 = dma.done.wait [#allocation5], 256  }
 0x215   :  { %628 = vsyncadd [#allocation5], 4294967040 }
 0x216   :  { %379 = vsyncpa [#allocation4], 1 }
 0x217   :  { %380 = vsyncpa [#allocation7], 1 }
 0x218   :  { %381 = vsyncpa [#allocation5], 1 }

</bundles_post_ra>
